<compile_context>
chip_gen: v7x
topology: tpu7x:2x2x1
jax: 0.10.0
libtpu: 0.0.40
codegen_flags: <defaults>
</compile_context>

<pallas_src>
import jax
import jax.numpy as jnp
from jax.experimental import pallas as pl
from jax.experimental.pallas import tpu as pltpu

HIDDEN = 200  # nn.Linear(features, 200)
OUT = 1       # nn.Linear(200, 1)
LANE = 128


def _round_up(n, m):
    return ((n + m - 1) // m) * m


def policy_net_kernel(xt_ref, w1_ref, b1_ref, w2_ref, b2_ref, o_ref):
    # xt_ref: [F, TB]  bf16     w1_ref: [Hp, F] bf16
    # b1_ref: [Hp, 1]  f32      w2_ref: [Hp, 1] f32     b2_ref: [1, 1] f32
    # o_ref : [1, TB]  f32      (batch lives in the lane dimension)
    # h^T = relu(W1 @ x^T + b1)  -- MXU matmul, f32 accumulation.
    h = jnp.dot(w1_ref[...], xt_ref[...], preferred_element_type=jnp.float32)
    h = jnp.maximum(h + b1_ref[...], 0.0)                       # [Hp, TB], f32
    # out = sigmoid(w2 . h + b2): VPU multiply + sublane (XLU) reduction,
    # result is already a lane-dense [1, TB] row.
    z = jnp.sum(h * w2_ref[...], axis=0, keepdims=True) + b2_ref[...]
    o_ref[...] = jax.nn.sigmoid(z).astype(o_ref.dtype)


def policy_net_forward(x, w1, b1, w2, b2, *, tb=2048):
    """x: [B, F] f32; w1: [F, H]; b1: [H]; w2: [H, 1]; b2: [1] -> [B, 1] f32."""
    B, F = x.shape
    H = w1.shape[1]
    Hp = max(LANE, _round_up(H, LANE))      # 200 -> 256 (lane multiple)

    # ---- tile-size selection -------------------------------------------------
    B_l = _round_up(B, LANE)
    # Explicit VMEM budget (bytes): x tile double-buffered (bf16) + f32 temps
    # (h / relu / product) + out tile double-buffered, plus resident weights.
    per_col = 2 * F * 2 + 3 * Hp * 4 + 2 * 4
    fixed = 2 * Hp * F * 2 + 2 * Hp * 4 + 4
    budget = 12 * 1024 * 1024               # stays under v5e's 16 MiB scoped default
    tb_cap = max(LANE, ((budget - fixed) // per_col) // LANE * LANE)
    tb_max = max(LANE, min(tb, tb_cap) // LANE * LANE)

    n_steps = -(-B_l // tb_max)
    if n_steps == 1 and B_l >= 2 * LANE:
        n_steps = 2                         # feed both v7x TensorCores
    TB = _round_up(-(-B_l // n_steps), LANE)
    B_pad = n_steps * TB

    # ---- operand preparation (transpose + cast + pad fuse into one XLA pass) -
    # Zero-padded batch columns produce garbage that is sliced off below; zero
    # padded hidden rows are killed by the zero rows of w2, so numerics match.
    xT = jnp.pad(x.T.astype(jnp.bfloat16), ((0, 0), (0, B_pad - B)))    # [F, Bp]
    w1T = jnp.pad(w1.T.astype(jnp.bfloat16), ((0, Hp - H), (0, 0)))     # [Hp, F]
    b1c = jnp.pad(b1.astype(jnp.float32), (0, Hp - H)).reshape(Hp, 1)
    w2c = jnp.pad(w2.astype(jnp.float32).reshape(H, 1), ((0, Hp - H), (0, 0)))
    b2c = b2.astype(jnp.float32).reshape(1, 1)

    cost = pl.CostEstimate(
        flops=2 * B_pad * F * Hp + 3 * B_pad * Hp,
        transcendentals=B_pad,
        bytes_accessed=B_pad * F * 2 + Hp * F * 2 + 2 * Hp * 4 + 4 + B_pad * 4,
    )

    out = pl.pallas_call(
        policy_net_kernel,
        out_shape=jax.ShapeDtypeStruct((n_steps, TB), jnp.float32),
        grid=(n_steps,),
        in_specs=[
            pl.BlockSpec((F, TB), lambda i: (0, i)),     # x^T : streamed per tile
            pl.BlockSpec((Hp, F), lambda i: (0, 0)),     # W1  : VMEM-resident
            pl.BlockSpec((Hp, 1), lambda i: (0, 0)),     # b1
            pl.BlockSpec((Hp, 1), lambda i: (0, 0)),     # w2 (column)
            pl.BlockSpec((1, 1), lambda i: (0, 0)),      # b2
        ],
        out_specs=pl.BlockSpec((1, TB), lambda i: (i, 0)),   # lane-dense rows
        compiler_params=pltpu.CompilerParams(
            dimension_semantics=("parallel",)),
        cost_estimate=cost,
    )(xT, w1T, b1c, w2c, b2c)

    # out[i, t] is the result for batch row i*TB + t.
    return out.reshape(B_pad)[:B].reshape(B, OUT)


def init_params(key, features):
    """Deterministic init matching PyTorch Linear's U(-1/sqrt(fan_in), +...)."""
    k1, k2, k3, k4 = jax.random.split(key, 4)
    bound1 = 1.0 / jnp.sqrt(features)
    bound2 = 1.0 / jnp.sqrt(HIDDEN)
    # Stored already transposed: [in, out] rather than PyTorch's [out, in].
    w1 = jax.random.uniform(k1, (features, HIDDEN), jnp.float32, -bound1, bound1)
    b1 = jax.random.uniform(k2, (HIDDEN,), jnp.float32, -bound1, bound1)
    w2 = jax.random.uniform(k3, (HIDDEN, OUT), jnp.float32, -bound2, bound2)
    b2 = jax.random.uniform(k4, (OUT,), jnp.float32, -bound2, bound2)
    return w1, b1, w2, b2


def reference_forward(x, w1, b1, w2, b2):
    h = jnp.maximum(x @ w1 + b1, 0.0)
    return jax.nn.sigmoid(h @ w2 + b2)


if __name__ == "__main__":
    key = jax.random.PRNGKey(0)
    k_x, k_p = jax.random.split(key)

    batch, features = 8, 32
    x = jax.random.normal(k_x, (batch, features), jnp.float32)
    w1, b1, w2, b2 = init_params(k_p, features)

    out = policy_net_forward(x, w1, b1, w2, b2)
    out = jax.block_until_ready(out)

    ref = reference_forward(x, w1, b1, w2, b2)
    assert out.shape == (batch, OUT)
    # bf16 matmul inputs (f32 accumulation) -> compare at bf16-input precision.
    assert jnp.allclose(out, ref, atol=2e-2, rtol=2e-2), "mismatch vs reference"

    print("KERNEL_OK")
</pallas_src>

<mosaic_0001>
module attributes {stable_mosaic.version = 11 : i64} {
  func.func @policy_net_kernel(%arg0: i32, %arg1: memref<32x128xbf16, #tpu.memory_space<vmem>>, %arg2: memref<256x32xbf16, #tpu.memory_space<vmem>>, %arg3: memref<256x1xf32, #tpu.memory_space<vmem>>, %arg4: memref<256x1xf32, #tpu.memory_space<vmem>>, %arg5: memref<1x1xf32, #tpu.memory_space<vmem>>, %arg6: memref<1x128xf32, #tpu.memory_space<vmem>>) attributes {dimension_semantics = [#tpu.dimension_semantics<parallel>], iteration_bounds = array<i64: 1>, scalar_prefetch = 0 : i64, scratch_operands = 0 : i64, tpu.core_type = #tpu.core_type<tc>, window_params = [{transform_indices = @transform_0, window_bounds = array<i64: 32, 128>}, {pipeline_mode = #tpu.pipeline_mode<synchronous>, transform_indices = @transform_1, window_bounds = array<i64: 256, 32>}, {pipeline_mode = #tpu.pipeline_mode<synchronous>, transform_indices = @transform_2, window_bounds = array<i64: 256, 1>}, {pipeline_mode = #tpu.pipeline_mode<synchronous>, transform_indices = @transform_3, window_bounds = array<i64: 256, 1>}, {pipeline_mode = #tpu.pipeline_mode<synchronous>, transform_indices = @transform_4, window_bounds = array<i64: 1, 1>}, {transform_indices = @transform_5, window_bounds = array<i64: 1, 128>}]} {
    %c0 = arith.constant 0 : index
    %c0_0 = arith.constant 0 : index
    %0 = vector.load %arg2[%c0, %c0_0] : memref<256x32xbf16, #tpu.memory_space<vmem>>, vector<256x32xbf16>
    %c0_1 = arith.constant 0 : index
    %c0_2 = arith.constant 0 : index
    %1 = vector.load %arg1[%c0_1, %c0_2] : memref<32x128xbf16, #tpu.memory_space<vmem>>, vector<32x128xbf16>
    %cst = arith.constant dense<0.000000e+00> : vector<256x128xf32>
    %2 = tpu.matmul %0, %1, %cst {dimension_numbers = #tpu.dot_dimension_numbers<[1], [0], [0], [1], [0, 0, 1, 1], [], []>} : vector<256x32xbf16>, vector<32x128xbf16>, vector<256x128xf32> -> vector<256x128xf32>
    %c0_3 = arith.constant 0 : index
    %c0_4 = arith.constant 0 : index
    %3 = vector.load %arg3[%c0_3, %c0_4] : memref<256x1xf32, #tpu.memory_space<vmem>>, vector<256x1xf32>
    %4 = vector.broadcast %3 : vector<256x1xf32> to vector<256x128xf32>
    %5 = arith.addf %2, %4 : vector<256x128xf32>
    %cst_5 = arith.constant 0.000000e+00 : f32
    %6 = vector.broadcast %cst_5 : f32 to vector<256x128xf32>
    %7 = arith.maximumf %5, %6 : vector<256x128xf32>
    %c0_6 = arith.constant 0 : index
    %c0_7 = arith.constant 0 : index
    %8 = vector.load %arg4[%c0_6, %c0_7] : memref<256x1xf32, #tpu.memory_space<vmem>>, vector<256x1xf32>
    %9 = vector.broadcast %8 : vector<256x1xf32> to vector<256x128xf32>
    %10 = arith.mulf %7, %9 : vector<256x128xf32>
    %cst_8 = arith.constant dense<0.000000e+00> : vector<128xf32>
    %11 = vector.multi_reduction <add>, %10, %cst_8 [0] : vector<256x128xf32> to vector<128xf32>
    %12 = vector.shape_cast %11 : vector<128xf32> to vector<1x128xf32>
    %c0_9 = arith.constant 0 : index
    %c0_10 = arith.constant 0 : index
    %13 = vector.load %arg5[%c0_9, %c0_10] : memref<1x1xf32, #tpu.memory_space<vmem>>, vector<1x1xf32>
    %14 = vector.broadcast %13 : vector<1x1xf32> to vector<1x128xf32>
    %15 = arith.addf %12, %14 : vector<1x128xf32>
    %16 = arith.negf %15 : vector<1x128xf32>
    %17 = math.exp %16 : vector<1x128xf32>
    %cst_11 = arith.constant 1.000000e+00 : f32
    %18 = vector.broadcast %cst_11 : f32 to vector<1x128xf32>
    %19 = arith.addf %18, %17 : vector<1x128xf32>
    %20 = arith.divf %18, %19 : vector<1x128xf32>
    %c0_12 = arith.constant 0 : index
    %c0_13 = arith.constant 0 : index
    %21 = vector.load %arg6[%c0_12, %c0_13] : memref<1x128xf32, #tpu.memory_space<vmem>>, vector<1x128xf32>
    tpu.vector_store %arg6[%c0_12, %c0_13], %20 {strides = array<i32>} : memref<1x128xf32, #tpu.memory_space<vmem>>, vector<1x128xf32>,
    return
  }
  func.func @transform_0(%arg0: i32) -> (i32, i32) {
    %c0_i32 = arith.constant 0 : i32
    %c0_i32_0 = arith.constant 0 : i32
    return %c0_i32, %arg0 : i32, i32
  }
  func.func @transform_1(%arg0: i32) -> (i32, i32) {
    %c0_i32 = arith.constant 0 : i32
    %c0_i32_0 = arith.constant 0 : i32
    %c0_i32_1 = arith.constant 0 : i32
    return %c0_i32, %c0_i32_0 : i32, i32
  }
  func.func @transform_2(%arg0: i32) -> (i32, i32) {
    %c0_i32 = arith.constant 0 : i32
    %c0_i32_0 = arith.constant 0 : i32
    %c0_i32_1 = arith.constant 0 : i32
    return %c0_i32, %c0_i32_0 : i32, i32
  }
  func.func @transform_3(%arg0: i32) -> (i32, i32) {
    %c0_i32 = arith.constant 0 : i32
    %c0_i32_0 = arith.constant 0 : i32
    %c0_i32_1 = arith.constant 0 : i32
    return %c0_i32, %c0_i32_0 : i32, i32
  }
  func.func @transform_4(%arg0: i32) -> (i32, i32) {
    %c0_i32 = arith.constant 0 : i32
    %c0_i32_0 = arith.constant 0 : i32
    %c0_i32_1 = arith.constant 0 : i32
    return %c0_i32, %c0_i32_0 : i32, i32
  }
  func.func @transform_5(%arg0: i32) -> (i32, i32) {
    %c0_i32 = arith.constant 0 : i32
    %c0_i32_0 = arith.constant 0 : i32
    return %arg0, %c0_i32 : i32, i32
  }
}

</mosaic_0001>

<bundles_post_ra>
// kernel: tpu_custom_call.1
= control target key start
LH: loop header
LB: loop body
LE: loop exit
PB: predicated region body
PF: predicated region fallthrough
CT: control target
= control target key end

     0   :  { %s1502_s0 = inlined_call_operand.vmem [shape: bf16[32,128], index: 0, kind: input, shape index: {}]   ;;  %s1503_s1 = inlined_call_operand.vmem [shape: bf16[256,32], index: 1, kind: input, shape index: {}]   ;;  %s1504_s2 = inlined_call_operand.vmem [shape: f32[256,1], index: 2, kind: input, shape index: {}]   ;;  %s1505_s3 = inlined_call_operand.vmem [shape: f32[256,1], index: 3, kind: input, shape index: {}]   ;;  %s1506_s4 = inlined_call_operand.<no memory space> [shape: f32[1,1], index: 4, kind: input, shape index: {}]   ;;  %s1507_s5 = inlined_call_operand.hbm [shape: f32[1,128], index: 5, kind: output, shape index: {}]  }
   0x1   :  { %v10_v0 = vstv %s1506_s4 }
   0x2   :  { %11 = vst [vmem:[#allocation2] sm:$0x1] %v10_v0 }
   0x3   :  { %v62_v1 = vld [vmem:[%s1504_s2 + $0x10] sm:$0xff]  ;;  %v60_v2 = vld [vmem:[%s1504_s2] sm:$0xff]  ;;  %v1022_v3 = vmov 0   ;;  %v63_v5 = vld [vmem:[%s1504_s2 + $0x18] sm:$0xff]  ;;  %vm344_vm0 = vcmask 261120  }
   0x4   :  { %975 = vset.pattern.permute.xlu1 %v1022_v3  ;;  %974 = vset.pattern.permute.xlu0 %v1022_v3  ;;  %v976_v4 = vld [vmem:[%s1502_s0] sm:$0xff]   ;;  %v61_v6 = vld [vmem:[%s1504_s2 + $0x8] sm:$0xff]  ;;  %v67_v14 = vld [vmem:[%s1504_s2 + $0x38] sm:$0xff] }
   0x5   :  { %104 = vperm.xlu1 %975, %v62_v1   ;;  %94 = vperm.xlu0 %974, %v60_v2   ;;  %v977_v7 = vld [vmem:[%s1502_s0 + $0x8] sm:$0xff]   ;;  %v978_v8 = vld [vmem:[%s1503_s1] sm:$0xff]   ;;  %v66_v15 = vld [vmem:[%s1504_s2 + $0x30] sm:$0xff] }
   0x6   :  { %932 = vmatprep.subr.bf16.mxu0 %v976_v4  ;;  %968 = vmatprep.subr.bf16.mxu1 %v976_v4  ;;  %v65_v9 = vld [vmem:[%s1504_s2 + $0x28] sm:$0xff]  ;;  %v64_v10 = vld [vmem:[%s1504_s2 + $0x20] sm:$0xff]  ;;  %v982_v16 = vld [vmem:[%s1503_s1 + $0x10] sm:$0xff]  }
   0x7   :  { %933 = vmatpush3.bf16.msra.mxu0 %v976_v4  ;;  %970 = vmatpush3.bf16.msra.mxu1 %v976_v4  ;;  %v979_v11 = vld [vmem:[%s1503_s1 + $0x40] sm:$0xff]   ;;  %v980_v12 = vld [vmem:[%s1503_s1 + $0x8] sm:$0xff]   ;;  %v983_v17 = vld [vmem:[%s1503_s1 + $0x50] sm:$0xff]  }
   0x8   :  { %934 = vmatprep.subr.bf16.mxu0 %v977_v7  ;;  %969 = vmatprep.subr.bf16.mxu1 %v977_v7  ;;  %v981_v13 = vld [vmem:[%s1503_s1 + $0x48] sm:$0xff]   ;;  %v68_v19 = vld [vmem:[%s1504_s2 + $0x40] sm:$0xff]  ;;  %v984_v20 = vld [vmem:[%s1503_s1 + $0x18] sm:$0xff]  }
   0x9   :  { %109 = vperm.xlu1 %975, %v63_v5   ;;  %99 = vperm.xlu0 %974, %v61_v6   ;;  %v69_v18 = vld [vmem:[%s1504_s2 + $0x48] sm:$0xff]  ;;  %v985_v21 = vld [vmem:[%s1503_s1 + $0x58] sm:$0xff]   ;;  %v986_v22 = vld [vmem:[%s1503_s1 + $0x20] sm:$0xff]  }
   0xa   :  { %936 = vmatprep.mubr.msk.bf16.mxu0 %vm344_vm0, %v978_v8  ;;  %952 = vmatprep.mubr.msk.bf16.mxu1 %vm344_vm0, %v979_v11  ;;  %v987_v23 = vld [vmem:[%s1503_s1 + $0x60] sm:$0xff]   ;;  %v71_v24 = vld [vmem:[%s1504_s2 + $0x58] sm:$0xff]  ;;  %v70_v25 = vld [vmem:[%s1504_s2 + $0x50] sm:$0xff] }
   0xb   :  { %935 = vmatpush3.bf16.msra.mxu0 %v977_v7  ;;  %971 = vmatpush3.bf16.msra.mxu1 %v977_v7  ;;  %v73_v26 = vld [vmem:[%s1504_s2 + $0x68] sm:$0xff]  ;;  %v72_v27 = vld [vmem:[%s1504_s2 + $0x60] sm:$0xff]  ;;  %v990_v30 = vld [vmem:[%s1503_s1 + $0x30] sm:$0xff]  }
   0xc   :  { %v988_v28 = vld [vmem:[%s1503_s1 + $0x28] sm:$0xff]   ;;  %v991_v31 = vld [vmem:[%s1503_s1 + $0x70] sm:$0xff]   ;;  %v75_v32 = vld [vmem:[%s1504_s2 + $0x78] sm:$0xff] }
   0xd   :  { %119 = vperm.xlu1 %975, %v65_v9   ;;  %114 = vperm.xlu0 %974, %v64_v10   ;;  %v989_v29 = vld [vmem:[%s1503_s1 + $0x68] sm:$0xff]   ;;  %v74_v33 = vld [vmem:[%s1504_s2 + $0x70] sm:$0xff]  ;;  %v76_v35 = vld [vmem:[%s1504_s2 + $0x80] sm:$0xff] }
   0xe   :  { %937 = vmatmul.mubr.msk.bf16.vlgmr.msra.gmra.mrb[0].mxu0 %vm344_vm0, %v980_v12  ;;  %953 = vmatmul.mubr.msk.bf16.vlgmr.msra.gmra.mrb[0].mxu1 %vm344_vm0, %v981_v13  ;;  %v77_v34 = vld [vmem:[%s1504_s2 + $0x88] sm:$0xff]  ;;  %v992_v36 = vld [vmem:[%s1503_s1 + $0x38] sm:$0xff]   ;;  %v78_v39 = vld [vmem:[%s1504_s2 + $0x90] sm:$0xff] }
   0xf   :  { %940 = vmatprep.mubr.msk.bf16.mxu0 %vm344_vm0, %v982_v16  ;;  %956 = vmatprep.mubr.msk.bf16.mxu1 %vm344_vm0, %v983_v17  ;;  %v993_v37 = vld [vmem:[%s1503_s1 + $0x78] sm:$0xff]   ;;  %v81_v40 = vld [vmem:[%s1504_s2 + $0xa8] sm:$0xff]  ;;  %v80_v41 = vld [vmem:[%s1504_s2 + $0xa0] sm:$0xff] }
  0x10   :  { %v79_v38 = vld [vmem:[%s1504_s2 + $0x98] sm:$0xff] }
  0x11   :  { %129 = vperm.xlu1 %975, %v67_v14   ;;  %124 = vperm.xlu0 %974, %v66_v15  }
  0x15   :  { %139 = vperm.xlu1 %975, %v69_v18   ;;  %134 = vperm.xlu0 %974, %v68_v19  }
  0x16   :  { %941 = vmatmul.mubr.msk.bf16.gmra.mrb[4].mxu0 %vm344_vm0, %v984_v20  ;;  %957 = vmatmul.mubr.msk.bf16.gmra.mrb[4].mxu1 %vm344_vm0, %v985_v21 }
  0x17   :  { %944 = vmatprep.mubr.msk.bf16.mxu0 %vm344_vm0, %v986_v22  ;;  %960 = vmatprep.mubr.msk.bf16.mxu1 %vm344_vm0, %v987_v23 }
  0x19   :  { %149 = vperm.xlu1 %975, %v71_v24   ;;  %144 = vperm.xlu0 %974, %v70_v25  }
  0x1d   :  { %159 = vperm.xlu1 %975, %v73_v26   ;;  %154 = vperm.xlu0 %974, %v72_v27  }
  0x1e   :  { %945 = vmatmul.mubr.msk.bf16.gmra.mrb[8].mxu0 %vm344_vm0, %v988_v28  ;;  %961 = vmatmul.mubr.msk.bf16.gmra.mrb[8].mxu1 %vm344_vm0, %v989_v29 }
  0x1f   :  { %948 = vmatprep.mubr.msk.bf16.mxu0 %vm344_vm0, %v990_v30  ;;  %964 = vmatprep.mubr.msk.bf16.mxu1 %vm344_vm0, %v991_v31 }
  0x21   :  { %169 = vperm.xlu1 %975, %v75_v32   ;;  %164 = vperm.xlu0 %974, %v74_v33  }
  0x25   :  { %179 = vperm.xlu1 %975, %v77_v34   ;;  %174 = vperm.xlu0 %974, %v76_v35  }
  0x26   :  { %949 = vmatmul.mubr.msk.bf16.gmra.mrb[12].mxu0 %vm344_vm0, %v992_v36  ;;  %965 = vmatmul.mubr.msk.bf16.gmra.mrb[12].mxu1 %vm344_vm0, %v993_v37 }
  0x29   :  { %189 = vperm.xlu1 %975, %v79_v38   ;;  %184 = vperm.xlu0 %974, %v78_v39  }
  0x2a   :  { %12 = vsyncpa [#allocation4], 0  ;;  %v586_v42 = vld [vmem:[%s1505_s3] sm:$0xff]  ;;  %v82_v43 = vld [vmem:[%s1504_s2 + $0xb0] sm:$0xff] }
  0x2b   :  { %v588_v44 = vld [vmem:[%s1505_s3 + $0x10] sm:$0xff]  ;;  %v587_v45 = vld [vmem:[%s1505_s3 + $0x8] sm:$0xff]  ;;  %v590_v46 = vld [vmem:[%s1505_s3 + $0x20] sm:$0xff] }
  0x2c   :  { %v589_v47 = vld [vmem:[%s1505_s3 + $0x18] sm:$0xff]  ;;  %v592_v48 = vld [vmem:[%s1505_s3 + $0x30] sm:$0xff]  ;;  %v591_v49 = vld [vmem:[%s1505_s3 + $0x28] sm:$0xff] }
  0x2d   :  { %199 = vperm.xlu1 %975, %v81_v40   ;;  %194 = vperm.xlu0 %974, %v80_v41   ;;  %v594_v50 = vld [vmem:[%s1505_s3 + $0x40] sm:$0xff]  ;;  %v593_v51 = vld [vmem:[%s1505_s3 + $0x38] sm:$0xff]  ;;  %v596_v52 = vld [vmem:[%s1505_s3 + $0x50] sm:$0xff] }
  0x2e   :  { %v595_v53 = vld [vmem:[%s1505_s3 + $0x48] sm:$0xff]  ;;  %v598_v54 = vld [vmem:[%s1505_s3 + $0x60] sm:$0xff]  ;;  %v597_v55 = vld [vmem:[%s1505_s3 + $0x58] sm:$0xff] }
  0x2f   :  { %v600_v56 = vld [vmem:[%s1505_s3 + $0x70] sm:$0xff]  ;;  %v599_v57 = vld [vmem:[%s1505_s3 + $0x68] sm:$0xff]  ;;  %v602_v58 = vld [vmem:[%s1505_s3 + $0x80] sm:$0xff] }
  0x30   :  { %v601_v59 = vld [vmem:[%s1505_s3 + $0x78] sm:$0xff]  ;;  %v604_v60 = vld [vmem:[%s1505_s3 + $0x90] sm:$0xff]  ;;  %v603_v61 = vld [vmem:[%s1505_s3 + $0x88] sm:$0xff] }
  0x31   :  { %620 = vperm.xlu1 %975, %v586_v42   ;;  %204 = vperm.xlu0 %974, %v82_v43   ;;  %v606_v62 = vld [vmem:[%s1505_s3 + $0xa0] sm:$0xff]  ;;  %v605_v63 = vld [vmem:[%s1505_s3 + $0x98] sm:$0xff]  ;;  %v607_v0 = vld [vmem:[%s1505_s3 + $0xa8] sm:$0xff] }
  0x32   :  { %v83_v1 = vld [vmem:[%s1504_s2 + $0xb8] sm:$0xff]  ;;  %v608_v2 = vld [vmem:[%s1505_s3 + $0xb0] sm:$0xff]  ;;  %v84_v3 = vld [vmem:[%s1504_s2 + $0xc0] sm:$0xff] }
  0x33   :  { %v609_v4 = vld [vmem:[%s1505_s3 + $0xb8] sm:$0xff]  ;;  %v85_v5 = vld [vmem:[%s1504_s2 + $0xc8] sm:$0xff]  ;;  %v610_v6 = vld [vmem:[%s1505_s3 + $0xc0] sm:$0xff] }
  0x34   :  { %v86_v7 = vld [vmem:[%s1504_s2 + $0xd0] sm:$0xff]  ;;  %v611_v8 = vld [vmem:[%s1505_s3 + $0xc8] sm:$0xff]  ;;  %v87_v9 = vld [vmem:[%s1504_s2 + $0xd8] sm:$0xff] }
  0x35   :  { %630 = vperm.xlu1 %975, %v588_v44   ;;  %625 = vperm.xlu0 %974, %v587_v45   ;;  %v612_v10 = vld [vmem:[%s1505_s3 + $0xd0] sm:$0xff]  ;;  %v88_v11 = vld [vmem:[%s1504_s2 + $0xe0] sm:$0xff]  ;;  %v613_v12 = vld [vmem:[%s1505_s3 + $0xd8] sm:$0xff] }
  0x36   :  { %v89_v13 = vld [vmem:[%s1504_s2 + $0xe8] sm:$0xff]  ;;  %v614_v14 = vld [vmem:[%s1505_s3 + $0xe0] sm:$0xff]  ;;  %v90_v15 = vld [vmem:[%s1504_s2 + $0xf0] sm:$0xff] }
  0x37   :  { %v615_v16 = vld [vmem:[%s1505_s3 + $0xe8] sm:$0xff]  ;;  %v91_v17 = vld [vmem:[%s1504_s2 + $0xf8] sm:$0xff]  ;;  %v616_v19 = vld [vmem:[%s1505_s3 + $0xf0] sm:$0xff]  ;;  %s1023_s2 = smov [#allocation3]  }
  0x38   :  { %v617_v18 = vld [vmem:[%s1505_s3 + $0xf8] sm:$0xff]  ;;  %v847_v20 = vld [vmem:[#allocation2] sm:$0x1]  ;;  %s871_s3 = sshll.u32 %s1023_s2, 4  ;;  %s872_s3 = int_to_ptr.vmem [resolvable:$true] %s871_s3 }
  0x39   :  { %640 = vperm.xlu1 %975, %v590_v46   ;;  %635 = vperm.xlu0 %974, %v589_v47   ;;  %s998_s18 = scalar_lea.vmem %s872_s3, 16  ;;  %s1002_s19 = scalar_lea.vmem %s872_s3, 32 }
  0x3a   :  { %p999_p0 = scmp.ne.s32.totalorder %s872_s3, %s998_s18  ;;  %p1003_p1 = scmp.lt.s32.totalorder %s872_s3, %s872_s3 }
  0x3b   :  { %p1004_p2 = scmp.lt.s32.totalorder %s1002_s19, %s998_s18 }
  0x3d   :  { %650 = vperm.xlu1 %975, %v592_v48   ;;  %645 = vperm.xlu0 %974, %v591_v49   ;;  %p1005_p3 = por %p1004_p2, %p1003_p1 }
  0x3f   :  { %p1006_p4 = pnand %p1005_p3, %p999_p0 }
  0x41   :  { %660 = vperm.xlu1 %975, %v594_v50   ;;  %655 = vperm.xlu0 %974, %v593_v51  }
  0x45   :  { %670 = vperm.xlu1 %975, %v596_v52   ;;  %665 = vperm.xlu0 %974, %v595_v53  }
  0x49   :  { %680 = vperm.xlu1 %975, %v598_v54   ;;  %675 = vperm.xlu0 %974, %v597_v55  }
  0x4d   :  { %690 = vperm.xlu1 %975, %v600_v56   ;;  %685 = vperm.xlu0 %974, %v599_v57  }
  0x51   :  { %700 = vperm.xlu1 %975, %v602_v58   ;;  %695 = vperm.xlu0 %974, %v601_v59  }
  0x55   :  { %710 = vperm.xlu1 %975, %v604_v60   ;;  %705 = vperm.xlu0 %974, %v603_v61  }
  0x59   :  { %720 = vperm.xlu1 %975, %v606_v62   ;;  %715 = vperm.xlu0 %974, %v605_v63  }
  0x5d   :  { %725 = vperm.xlu1 %975, %v607_v0   ;;  %209 = vperm.xlu0 %974, %v83_v1  }
  0x61   :  { %730 = vperm.xlu1 %975, %v608_v2   ;;  %214 = vperm.xlu0 %974, %v84_v3  }
  0x65   :  { %735 = vperm.xlu1 %975, %v609_v4   ;;  %219 = vperm.xlu0 %974, %v85_v5  }
  0x69   :  { %740 = vperm.xlu1 %975, %v610_v6   ;;  %224 = vperm.xlu0 %974, %v86_v7  }
  0x6d   :  { %745 = vperm.xlu1 %975, %v611_v8   ;;  %229 = vperm.xlu0 %974, %v87_v9  }
  0x71   :  { %750 = vperm.xlu1 %975, %v612_v10   ;;  %234 = vperm.xlu0 %974, %v88_v11  }
  0x75   :  { %755 = vperm.xlu1 %975, %v613_v12   ;;  %239 = vperm.xlu0 %974, %v89_v13  }
  0x79   :  { %760 = vperm.xlu1 %975, %v614_v14   ;;  %244 = vperm.xlu0 %974, %v90_v15  }
  0x7d   :  { %765 = vperm.xlu1 %975, %v615_v16   ;;  %249 = vperm.xlu0 %974, %v91_v17  }
  0x81   :  { %775 = vperm.xlu1 %975, %v617_v18   ;;  %770 = vperm.xlu0 %974, %v616_v19  }
  0x84   :  { %v105_v21 = vpop.permute.xlu1 %104  ;;  %v95_v22 = vpop.permute.xlu0 %94 }
  0x85   :  { %850 = vperm.xlu0 %974, %v847_v20  }
  0x88   :  { %v110_v23 = vpop.permute.xlu1 %109  ;;  %v100_v24 = vpop.permute.xlu0 %99 }
  0x8c   :  { %v1319_v25 = vpop.permute.xlu1 %119  ;;  %v1321_v26 = vpop.permute.xlu0 %114 }
  0x90   :  { %v1323_v27 = vpop.permute.xlu1 %129  ;;  %v1325_v28 = vpop.permute.xlu0 %124 }
  0x94   :  { %v1327_v29 = vpop.permute.xlu1 %139  ;;  %v1329_v30 = vpop.permute.xlu0 %134 }
  0x98   :  { %v1331_v31 = vpop.permute.xlu1 %149  ;;  %v1333_v32 = vpop.permute.xlu0 %144 }
  0x9c   :  { %v1335_v33 = vpop.permute.xlu1 %159  ;;  %v1337_v34 = vpop.permute.xlu0 %154 }
  0xa0   :  { %v1339_v35 = vpop.permute.xlu1 %169  ;;  %v1341_v36 = vpop.permute.xlu0 %164 }
  0xa4   :  { %v1343_v37 = vpop.permute.xlu1 %179  ;;  %v1345_v38 = vpop.permute.xlu0 %174 }
  0xa8   :  { %v1347_v39 = vpop.permute.xlu1 %189  ;;  %v1349_v40 = vpop.permute.xlu0 %184 }
  0xac   :  { %v1351_v41 = vpop.permute.xlu1 %199  ;;  %v1353_v42 = vpop.permute.xlu0 %194 }
  0xb0   :  { %v621_v43 = vpop.permute.xlu1 %620  ;;  %v1355_v44 = vpop.permute.xlu0 %204 }
  0xb4   :  { %v631_v45 = vpop.permute.xlu1 %630  ;;  %v626_v46 = vpop.permute.xlu0 %625 }
  0xb8   :  { %v641_v47 = vpop.permute.xlu1 %640  ;;  %v636_v48 = vpop.permute.xlu0 %635 }
  0xbc   :  { %v1357_v49 = vpop.permute.xlu1 %650  ;;  %v1359_v50 = vpop.permute.xlu0 %645 }
  0xc0   :  { %v1361_v51 = vpop.permute.xlu1 %660  ;;  %v1363_v52 = vpop.permute.xlu0 %655 }
  0xc4   :  { %v1365_v53 = vpop.permute.xlu1 %670  ;;  %v1367_v54 = vpop.permute.xlu0 %665 }
  0xc8   :  { %v1369_v55 = vpop.permute.xlu1 %680  ;;  %v1371_v56 = vpop.permute.xlu0 %675 }
  0xcc   :  { %v1373_v57 = vpop.permute.xlu1 %690  ;;  %v1375_v58 = vpop.permute.xlu0 %685 }
  0xd0   :  { %v1377_v59 = vpop.permute.xlu1 %700  ;;  %v1379_v60 = vpop.permute.xlu0 %695 }
  0xd4   :  { %v1381_v61 = vpop.permute.xlu1 %710  ;;  %v1383_v62 = vpop.permute.xlu0 %705 }
  0xd8   :  { %v1385_v63 = vpop.permute.xlu1 %720  ;;  %v1387_v0 = vpop.permute.xlu0 %715 }
  0xd9   :  { %1508 = vst [vmem:[#allocation6_spill] sm:$0xff] %v1385_v63  ;;  %1509 = vst [vmem:[#allocation7_spill] sm:$0xff] %v1387_v0 }
  0xdc   :  { %v1397_v14 = vpop.permute.xlu1 %725  ;;  %v1399_v15 = vpop.permute.xlu0 %209 }
  0xdd   :  { %1510 = vst [vmem:[#allocation8_spill] sm:$0xff] %v1397_v14  ;;  %1511 = vst [vmem:[#allocation9_spill] sm:$0xff] %v1399_v15 }
  0xe1   :  { %v938_v1 = vpop.f32.mrb[0].mxu0  ;;  %v1389_v2 = vpop.f32.mrb[0].mxu1 }
  0xe2   :  { %v427_v3 = vpop.f32.mrb[1].mxu0  ;;  %v1391_v4 = vpop.f32.mrb[1].mxu1  ;;  %v436_v8 = vadd.f32 %v938_v1, %v105_v21 }
  0xe3   :  { %v428_v5 = vadd.f32 %v427_v3, %v95_v22  ;;  %v939_v6 = vpop.f32.mrb[2].mxu0  ;;  %v1393_v7 = vpop.f32.mrb[2].mxu1 }
  0xe4   :  { %v430_v9 = vpop.f32.mrb[3].mxu0  ;;  %v1395_v10 = vpop.f32.mrb[3].mxu1  ;;  %v439_v11 = vadd.f32 %v939_v6, %v110_v23  ;;  %v556_v16 = vmax.f32 %v436_v8, 0.0 }
  0xe5   :  { %v554_v12 = vmax.f32 %v428_v5, 0.0  ;;  %v431_v13 = vadd.f32 %v430_v9, %v100_v24 }
  0xe6   :  { %v557_v20 = vmax.f32 %v439_v11, 0.0  ;;  %v780_v24 = vmul.f32 %v631_v45, %v556_v16 }
  0xe7   :  { %v555_v17 = vmax.f32 %v431_v13, 0.0  ;;  %v778_v21 = vmul.f32 %v621_v43, %v554_v12 }
  0xe8   :  { %v781_v15 = vmul.f32 %v636_v48, %v557_v20 }
  0xe9   :  { %v942_v18 = vpop.f32.mrb[4].mxu0  ;;  %v1401_v19 = vpop.f32.mrb[4].mxu1  ;;  %v779_v1 = vmul.f32 %v626_v46, %v555_v17 }
  0xea   :  { %1512 = vst [vmem:[#allocation10_spill] sm:$0xff] %v1401_v19  ;;  %v443_v22 = vpop.f32.mrb[5].mxu0  ;;  %v1403_v3 = vpop.f32.mrb[5].mxu1  ;;  %v452_v9 = vadd.f32 %v942_v18, %v1325_v28 }
  0xeb   :  { %v444_v63 = vadd.f32 %v443_v22, %v1321_v26  ;;  %v943_v23 = vpop.f32.mrb[6].mxu0  ;;  %v1406_v5 = vpop.f32.mrb[6].mxu1  ;;  %v810_v6 = vadd.f32 %v779_v1, %v778_v21 }
  0xec   :  { %v446_v13 = vpop.f32.mrb[7].mxu0  ;;  %v1409_v14 = vpop.f32.mrb[7].mxu1  ;;  %v455_v19 = vadd.f32 %v943_v23, %v1323_v27  ;;  %v560_v12 = vmax.f32 %v452_v9, 0.0 }
  0xed   :  { %v558_v8 = vmax.f32 %v444_v63, 0.0  ;;  %v811_v11 = vadd.f32 %v810_v6, %v780_v24  ;;  %v447_v43 = vadd.f32 %v446_v13, %v1319_v25  ;;  %v1413_v46 = vpop.permute.xlu1 %730  ;;  %v1415_v26 = vpop.permute.xlu0 %214 }
  0xee   :  { %v561_v20 = vmax.f32 %v455_v19, 0.0  ;;  %v784_v21 = vmul.f32 %v1357_v49, %v560_v12 }
  0xef   :  { %v782_v0 = vmul.f32 %v641_v47, %v558_v8  ;;  %v812_v45 = vadd.f32 %v811_v11, %v781_v15  ;;  %v559_v16 = vmax.f32 %v447_v43, 0.0 }
  0xf1   :  { %v946_v17 = vpop.f32.mrb[8].mxu0  ;;  %v1417_v28 = vpop.f32.mrb[8].mxu1  ;;  %v813_v48 = vadd.f32 %v812_v45, %v782_v0  ;;  %v783_v47 = vmul.f32 %v1359_v50, %v559_v16  ;;  %v785_v0 = vmul.f32 %v1363_v52, %v561_v20 }
  0xf2   :  { %v459_v63 = vpop.f32.mrb[9].mxu0  ;;  %v1419_v18 = vpop.f32.mrb[9].mxu1  ;;  %v468_v15 = vadd.f32 %v946_v17, %v1333_v32 }
  0xf3   :  { %v460_v27 = vadd.f32 %v459_v63, %v1329_v30  ;;  %v947_v25 = vpop.f32.mrb[10].mxu0  ;;  %v1423_v22 = vpop.f32.mrb[10].mxu1  ;;  %v814_v1 = vadd.f32 %v813_v48, %v783_v47 }
  0xf4   :  { %v462_v24 = vpop.f32.mrb[11].mxu0  ;;  %v1427_v6 = vpop.f32.mrb[11].mxu1  ;;  %v471_v30 = vadd.f32 %v947_v25, %v1331_v31  ;;  %v564_v11 = vmax.f32 %v468_v15, 0.0 }
  0xf5   :  { %v562_v23 = vmax.f32 %v460_v27, 0.0  ;;  %v463_v9 = vadd.f32 %v462_v24, %v1327_v29  ;;  %v815_v19 = vadd.f32 %v814_v1, %v784_v21  ;;  %v1433_v8 = vpop.permute.xlu1 %735  ;;  %v1435_v13 = vpop.permute.xlu0 %219 }
  0xf6   :  { %v565_v17 = vmax.f32 %v471_v30, 0.0  ;;  %v788_v48 = vmul.f32 %v1365_v53, %v564_v11  ;;  %v492_v53 = vadd.f32 %v1391_v4, %v1345_v38  ;;  %v495_v30 = vadd.f32 %v1395_v10, %v1343_v37 }
  0xf7   :  { %v786_v50 = vmul.f32 %v1361_v51, %v562_v23  ;;  %v563_v49 = vmax.f32 %v463_v9, 0.0  ;;  %v816_v32 = vadd.f32 %v815_v19, %v785_v0  ;;  %v503_v38 = vadd.f32 %v1393_v7, %v1347_v39 }
  0xf8   :  { %v789_v15 = vmul.f32 %v1371_v56, %v565_v17  ;;  %v570_v11 = vmax.f32 %v492_v53, 0.0  ;;  %v571_v4 = vmax.f32 %v495_v30, 0.0  ;;  %v508_v10 = vadd.f32 %v1403_v3, %v1353_v42  ;;  %v1515_v42 = vld [vmem:[#allocation9_spill] sm:$0xff] }
  0xf9   :  { %v950_v43 = vpop.f32.mrb[12].mxu0  ;;  %v1437_v12 = vpop.f32.mrb[12].mxu1  ;;  %v787_v45 = vmul.f32 %v1367_v54, %v563_v49  ;;  %v817_v52 = vadd.f32 %v816_v32, %v786_v50  ;;  %v511_v17 = vadd.f32 %v1409_v14, %v1351_v41  ;;  %v519_v3 = vadd.f32 %v1406_v5, %v1515_v42 }
  0xfa   :  { %v475_v29 = vpop.f32.mrb[13].mxu0  ;;  %v1440_v16 = vpop.f32.mrb[13].mxu1  ;;  %v484_v47 = vadd.f32 %v950_v43, %v1341_v36  ;;  %v794_v37 = vmul.f32 %v1377_v59, %v570_v11  ;;  %v524_v14 = vadd.f32 %v1419_v18, %v1415_v26 }
  0xfb   :  { %v476_v51 = vadd.f32 %v475_v29, %v1337_v34  ;;  %v951_v31 = vpop.f32.mrb[14].mxu0  ;;  %v1443_v63 = vpop.f32.mrb[14].mxu1  ;;  %v818_v20 = vadd.f32 %v817_v52, %v787_v45 }
  0xfc   :  { %v478_v25 = vpop.f32.mrb[15].mxu0  ;;  %v1447_v21 = vpop.f32.mrb[15].mxu1  ;;  %v487_v24 = vadd.f32 %v951_v31, %v1339_v35  ;;  %v568_v36 = vmax.f32 %v484_v47, 0.0 }
  0xfd   :  { %v566_v27 = vmax.f32 %v476_v51, 0.0  ;;  %v225_v54 = vpop.permute.xlu0 %224  ;;  %v479_v1 = vadd.f32 %v478_v25, %v1335_v33  ;;  %v819_v23 = vadd.f32 %v818_v20, %v788_v48  ;;  %v741_v9 = vpop.permute.xlu1 %740  ;;  %v574_v48 = vmax.f32 %v508_v10, 0.0  ;;  %v1514_v20 = vld [vmem:[#allocation7_spill] sm:$0xff] }
  0xfe   :  { %v569_v49 = vmax.f32 %v487_v24, 0.0  ;;  %v792_v35 = vmul.f32 %v1373_v57, %v568_v36  ;;  %v795_v57 = vmul.f32 %v1383_v62, %v571_v4  ;;  %v532_v36 = vadd.f32 %v1417_v28, %v225_v54 }
  0xff   :  { %v790_v34 = vmul.f32 %v1369_v55, %v566_v27  ;;  %v567_v0 = vmax.f32 %v479_v1, 0.0  ;;  %v820_v19 = vadd.f32 %v819_v23, %v789_v15  ;;  %v500_v55 = vadd.f32 %v1389_v2, %v1349_v40  ;;  %v1516_v15 = vld [vmem:[#allocation6_spill] sm:$0xff] }
 0x100   :  { %v573_v2 = vmax.f32 %v503_v38, 0.0  ;;  %v575_v27 = vmax.f32 %v511_v17, 0.0  ;;  %v798_v41 = vmul.f32 %v1516_v15, %v574_v48  ;;  %v580_v11 = vmax.f32 %v532_v36, 0.0 }
 0x101   :  { %v791_v50 = vmul.f32 %v1375_v58, %v567_v0  ;;  %v821_v33 = vadd.f32 %v820_v19, %v790_v34  ;;  %v230_v56 = vpop.permute.xlu0 %229  ;;  %v746_v43 = vpop.permute.xlu1 %745  ;;  %v793_v58 = vmul.f32 %v1379_v60, %v569_v49  ;;  %v572_v29 = vmax.f32 %v500_v55, 0.0  ;;  %v1513_v60 = vld [vmem:[#allocation10_spill] sm:$0xff] }
 0x102   :  { %v516_v31 = vadd.f32 %v1513_v60, %v1355_v44  ;;  %v797_v47 = vmul.f32 %v1514_v20, %v573_v2  ;;  %v577_v34 = vmax.f32 %v519_v3, 0.0  ;;  %v1517_v44 = vld [vmem:[#allocation8_spill] sm:$0xff]  ;;  %v527_v0 = vadd.f32 %v1427_v6, %v1435_v13 }
 0x103   :  { %v822_v32 = vadd.f32 %v821_v33, %v791_v50  ;;  %v796_v7 = vmul.f32 %v1381_v61, %v572_v29  ;;  %v799_v24 = vmul.f32 %v1517_v44, %v575_v27  ;;  %v578_v19 = vmax.f32 %v524_v14, 0.0 }
 0x104   :  { %v576_v1 = vmax.f32 %v516_v31, 0.0  ;;  %v535_v30 = vadd.f32 %v1423_v22, %v230_v56  ;;  %v801_v26 = vmul.f32 %v1433_v8, %v577_v34  ;;  %v579_v18 = vmax.f32 %v527_v0, 0.0 }
 0x105   :  { %v823_v45 = vadd.f32 %v822_v32, %v792_v35  ;;  %v235_v40 = vpop.permute.xlu0 %234  ;;  %v751_v39 = vpop.permute.xlu1 %750  ;;  %v802_v35 = vmul.f32 %v741_v9, %v578_v19  ;;  %v853_v31 = vlaneseq }
 0x106   :  { %v800_v5 = vmul.f32 %v1413_v46, %v576_v1  ;;  %v540_v32 = vadd.f32 %v1440_v16, %v235_v40  ;;  %v581_v13 = vmax.f32 %v535_v30, 0.0  ;;  %v803_v38 = vmul.f32 %v746_v43, %v579_v18 }
 0x107   :  { %v824_v52 = vadd.f32 %v823_v45, %v793_v58  ;;  %v804_v4 = vmul.f32 %v751_v39, %v580_v11 }
 0x108   :  { %v582_v58 = vmax.f32 %v540_v32, 0.0 }
 0x109   :  { %v825_v51 = vadd.f32 %v824_v52, %v794_v37  ;;  %v240_v62 = vpop.permute.xlu0 %239  ;;  %v756_v23 = vpop.permute.xlu1 %755 }
 0x10a   :  { %v543_v46 = vadd.f32 %v1447_v21, %v240_v62  ;;  %v805_v56 = vmul.f32 %v756_v23, %v581_v13 }
 0x10b   :  { %v826_v59 = vadd.f32 %v825_v51, %v795_v57 }
 0x10c   :  { %v583_v37 = vmax.f32 %v543_v46, 0.0 }
 0x10d   :  { %v827_v25 = vadd.f32 %v826_v59, %v796_v7  ;;  %v245_v33 = vpop.permute.xlu0 %244  ;;  %v761_v55 = vpop.permute.xlu1 %760  ;;  %v854_v59 = vshrl.u32 %v853_v31, 7 }
 0x10e   :  { %v548_v8 = vadd.f32 %v1437_v12, %v245_v33  ;;  %v806_v10 = vmul.f32 %v761_v55, %v582_v58 }
 0x10f   :  { %v828_v61 = vadd.f32 %v827_v25, %v797_v47  ;;  %v855_v20 = vsub.s32 0, %v854_v59 }
 0x110   :  { %v584_v40 = vmax.f32 %v548_v8, 0.0 }
 0x111   :  { %v829_v53 = vadd.f32 %v828_v61, %v798_v41  ;;  %v250_v54 = vpop.permute.xlu0 %249  ;;  %v766_v45 = vpop.permute.xlu1 %765 }
 0x112   :  { %v551_v29 = vadd.f32 %v1443_v63, %v250_v54  ;;  %v807_v2 = vmul.f32 %v766_v45, %v583_v37 }
 0x113   :  { %v830_v50 = vadd.f32 %v829_v53, %v799_v24 }
 0x114   :  { %v585_v43 = vmax.f32 %v551_v29, 0.0 }
 0x115   :  { %v831_v49 = vadd.f32 %v830_v50, %v800_v5  ;;  %v771_v52 = vpop.permute.xlu0 %770  ;;  %v776_v57 = vpop.permute.xlu1 %775 }
 0x116   :  { %v808_v17 = vmul.f32 %v771_v52, %v584_v40  ;;  %v809_v39 = vmul.f32 %v776_v57, %v585_v43 }
 0x117   :  { %v832_v6 = vadd.f32 %v831_v49, %v801_v26 }
 0x119   :  { %v833_v28 = vadd.f32 %v832_v6, %v802_v35  ;;  %v851_v42 = vpop.permute.xlu0 %850 }
 0x11a   :  { %v856_v25 = vrot.slane %v851_v42, %v855_v20 }
 0x11b   :  { %v834_v22 = vadd.f32 %v833_v28, %v803_v38 }
 0x11d   :  { %v835_v9 = vadd.f32 %v834_v22, %v804_v4 }
 0x11f   :  { %v836_v16 = vadd.f32 %v835_v9, %v805_v56 }
 0x121   :  { %v837_v21 = vadd.f32 %v836_v16, %v806_v10 }
 0x123   :  { %v838_v51 = vadd.f32 %v837_v21, %v807_v2 }
 0x125   :  { %v839_v7 = vadd.f32 %v838_v51, %v808_v17 }
 0x127   :  { %v840_v60 = vadd.f32 %v839_v7, %v809_v39 }
 0x129   :  { %v841_v48 = vrot.slane %v840_v60, 4 }
 0x12b   :  { %v842_v12 = vadd.f32 %v841_v48, %v840_v60 }
 0x12d   :  { %v843_v63 = vrot.slane %v842_v12, 2 }
 0x12f   :  { %v844_v47 = vadd.f32 %v843_v63, %v842_v12 }
 0x131   :  { %v845_v3 = vrot.slane %v844_v47, 1 }
 0x133   :  { %v846_v27 = vadd.f32 %v845_v3, %v844_v47 }
 0x135   :  { %v857_v62 = vadd.f32 %v856_v25, %v846_v27 }
 0x137   :  { %v913_v1 = vmul.f32 -1.442695, %v857_v62 }
 0x139   :  { %994 = vpow2.f32 %v913_v1 }
 0x143   :  { %v995_v15 = vpop.eup %994 }
 0x144   :  { %v861_v41 = vadd.f32 1.0, %v995_v15 }
 0x146   :  { %996 = vrcp.f32 %v861_v41 }
 0x150   :  { %v997_v14 = vpop.eup %996 }
 0x151   :  { %864 = vst [vmem:[#allocation3] sm:$0x1] %v997_v14 }
 0x152   :  { %1009 = shalt.err (!%p1006_p4)
}
 0x153   :  { %s1010_s22 = scalar_lea.hbm %s1507_s5, 16 }
 0x154   :  { %p1011_p5 = scmp.ne.s32.totalorder %s1507_s5, %s1010_s22  ;;  %p1014_p6 = scmp.lt.u32.totalorder %s1010_s22, %s1507_s5 }
 0x156   :  { %p1016_p7 = pnand %p1014_p6, %p1011_p5 }
 0x158   :  { %1019 = shalt.err (!%p1016_p7)
}
 0x159   :  { %874 = dma.vmem_to_hbm [thread:$0]  %s872_s3, 16, %s1507_s5, [#allocation4]  }
 0x15a   :  { %1020 = dma.done.wait [#allocation4], 16  }
 0x15b   :  { %1021 = vsyncadd [#allocation4], 4294967280 }
 0x15c   :  { %878 = vsyncpa [#allocation4], 1 }

</bundles_post_ra>
